<compile_context>
chip_gen: v6e
topology: v6e:2x2x1
jax: 0.10.0
libtpu: 0.0.40
codegen_flags: <defaults>
</compile_context>

<pallas_src>
import jax
import jax.numpy as jnp
from jax.experimental import pallas as pl
from jax.experimental.pallas import tpu as pltpu

_EPS = 1e-12            # matches torch.nn.functional.normalize default eps
_TINY = _EPS * _EPS
_NCHAN_IN = 21          # 9 sphere face-vert + 3 sphere query + 9 mesh face-vert


def _uv_to_3d_kernel(in_ref, out_ref):
    """Barycentric blend of face vertices for one (tile, 128) slab of points.

    in_ref (21, T, 128) float32, channel layout:
      0:3   sphere-mapped uv coords of face vertex A (x, y, z)
      3:6   vertex B, 6:9 vertex C
      9:12  sphere-mapped query point P (x, y, z)
      12:15 mesh 3-D coords of face vertex A, 15:18 vertex B, 18:21 vertex C
    out_ref (3, T, 128): blended 3-D points (x, y, z channel slabs).
    """
    Ax, Ay, Az = in_ref[0], in_ref[1], in_ref[2]
    ABx, ABy, ABz = in_ref[3] - Ax, in_ref[4] - Ay, in_ref[5] - Az
    ACx, ACy, ACz = in_ref[6] - Ax, in_ref[7] - Ay, in_ref[8] - Az
    APx, APy, APz = in_ref[9] - Ax, in_ref[10] - Ay, in_ref[11] - Az

    # remove_component_perpendicular_to_face with the normalization folded into
    # the projection: APp = AP - n * ((n.AP) / (n.n)).  No rsqrt, no unit-normal
    # temporaries (3 fewer full-tile live values than before).
    nx = ABy * ACz - ABz * ACy
    ny = ABz * ACx - ABx * ACz
    nz = ABx * ACy - ABy * ACx
    n2 = nx * nx + ny * ny + nz * nz
    d = (nx * APx + ny * APy + nz * APz) / jnp.maximum(n2, _TINY)
    APpx = APx - nx * d
    APpy = APy - ny * d
    APpz = APz - nz * d
    # BP' = P' - B = AP' - AB ;  BC = AC - AB (never re-touches raw B/C slabs)
    BPpx, BPpy, BPpz = APpx - ABx, APpy - ABy, APpz - ABz
    BCx, BCy, BCz = ACx - ABx, ACy - ABy, ACz - ABz

    def cross_norm(ax, ay, az, bx, by, bz):
        cx = ay * bz - az * by
        cy = az * bx - ax * bz
        cz = ax * by - ay * bx
        return jnp.sqrt(cx * cx + cy * cy + cz * cz)

    # compute_barycentric_coordinates: areaBAC cancels under the L1 norm and
    # the areas are >= 0, so no abs / extra divides are needed.
    area_bap = cross_norm(ABx, ABy, ABz, APpx, APpy, APpz)   # -> weight of C
    area_cap = cross_norm(ACx, ACy, ACz, APpx, APpy, APpz)   # -> weight of B
    area_cbp = cross_norm(BCx, BCy, BCz, BPpx, BPpy, BPpz)   # -> weight of A
    # Exact normalization (the approx reciprocal in v2 was the accuracy risk).
    inv_s = 1.0 / jnp.maximum(area_bap + area_cap + area_cbp, _EPS)
    wb = area_bap * inv_s
    vb = area_cap * inv_s
    ub = area_cbp * inv_s

    # points3d = u*A + v*B + w*C, per channel -> lane-dense (T, 128) stores.
    out_ref[0] = (ub * in_ref[12] + vb * in_ref[15] + wb * in_ref[18]).astype(out_ref.dtype)
    out_ref[1] = (ub * in_ref[13] + vb * in_ref[16] + wb * in_ref[19]).astype(out_ref.dtype)
    out_ref[2] = (ub * in_ref[14] + vb * in_ref[17] + wb * in_ref[20]).astype(out_ref.dtype)


def _sphere_from_uv(uv):
    # geom_utils.convert_uv_to_3d_coordinates
    phi = 2.0 * jnp.pi * (uv[..., 0] - 0.5)
    theta = jnp.pi * (uv[..., 1] - 0.5)
    ct = jnp.cos(theta)
    return jnp.stack([ct * jnp.cos(phi), ct * jnp.sin(phi), jnp.sin(theta)], -1)


def _pick_tile_rows(rows, out_itemsize, max_tile_rows=256):
    """Tile height: multiple of the sublane alignment (8 for f32, 16 for bf16),
    capped at max_tile_rows, sized so the 1-D grid has >= 2 (target ~4) steps
    -> megacore sharding on v7x and pipeline overlap for small workloads."""
    align = max(8, 32 // int(out_itemsize))
    target = -(-rows // 4)                       # aim for ~4 grid steps
    tile = -(-target // align) * align
    return max(align, min(max_tile_rows, tile))


class UVTo3D:
    """JAX/Pallas port of acsm UVTo3D (forward pass only)."""

    def __init__(self, mean_shape):
        self.face_inds = jnp.asarray(mean_shape['face_inds'], jnp.int32)   # (Hm, Wm)
        self.faces = jnp.asarray(mean_shape['faces'], jnp.int32)           # (F, 3)
        self.verts_uv = jnp.asarray(mean_shape['uv_verts'], jnp.float32)   # (V, 2)
        uv_map = mean_shape['uv_map']
        self.uv_map_size = jnp.array(
            [uv_map.shape[1] - 1, uv_map.shape[0] - 1], jnp.float32)
        # Sphere-map the tiny (V, 2) uv-vertex table ONCE; the kernel never
        # runs trig on gathered face vertices.
        self.verts_uv_sph = _sphere_from_uv(self.verts_uv)                 # (V, 3)

    def __call__(self, verts, uv, *, max_tile_rows=256):
        B, HW, _ = uv.shape
        n_pts = B * HW
        out_dtype = verts.dtype
        rows = -(-n_pts // 128)
        tile = _pick_tile_rows(rows, jnp.dtype(out_dtype).itemsize, max_tile_rows)
        padded_rows = -(-rows // tile) * tile
        n_pad = padded_rows * 128
        grid = padded_rows // tile

        # ---- glue (plain JAX): face lookup, gathers, sphere-map the queries ----
        uv_inds = jnp.round(uv * self.uv_map_size).astype(jnp.int32)
        face_idx = self.face_inds[uv_inds[..., 1], uv_inds[..., 0]]        # (B, HW)
        tri = self.faces[face_idx]                                         # (B, HW, 3)
        tA, tB, tC = tri[..., 0], tri[..., 1], tri[..., 2]

        def g_static(col, idx):            # gather from a static (V,) table
            return col[idx].reshape(n_pts)

        def g_batched(col, idx):           # gather from a per-batch (B, V) table
            return jnp.take_along_axis(col, idx, axis=1).reshape(n_pts)

        sx, sy, sz = (self.verts_uv_sph[:, c] for c in range(3))
        vx, vy, vz = (verts[..., c].astype(jnp.float32) for c in range(3))
        # Query-point sphere mapping done with the same XLA math as the
        # reference (keeps the in-kernel arithmetic purely rational + sqrt).
        psph = _sphere_from_uv(uv.astype(jnp.float32))                     # (B, HW, 3)

        chans = [
            g_static(sx, tA), g_static(sy, tA), g_static(sz, tA),
            g_static(sx, tB), g_static(sy, tB), g_static(sz, tB),
            g_static(sx, tC), g_static(sy, tC), g_static(sz, tC),
            psph[..., 0].reshape(n_pts), psph[..., 1].reshape(n_pts),
            psph[..., 2].reshape(n_pts),
            g_batched(vx, tA), g_batched(vy, tA), g_batched(vz, tA),
            g_batched(vx, tB), g_batched(vy, tB), g_batched(vz, tB),
            g_batched(vx, tC), g_batched(vy, tC), g_batched(vz, tC),
        ]
        packed = jnp.stack(chans, 0)                                       # (21, n_pts)
        if n_pad != n_pts:
            # zero padding: padded rows produce finite zeros and are sliced off
            packed = jnp.pad(packed, ((0, 0), (0, n_pad - n_pts)))
        packed = packed.reshape(_NCHAN_IN, padded_rows, 128)

        out = pl.pallas_call(
            _uv_to_3d_kernel,
            out_shape=jax.ShapeDtypeStruct((3, padded_rows, 128), out_dtype),
            grid=(grid,),
            in_specs=[pl.BlockSpec((_NCHAN_IN, tile, 128), lambda r: (0, r, 0))],
            out_specs=pl.BlockSpec((3, tile, 128), lambda r: (0, r, 0)),
            compiler_params=pltpu.CompilerParams(
                dimension_semantics=("parallel",),
                vmem_limit_bytes=48 * 1024 * 1024),    # safe on v7x's 64 MiB VMEM
        )(packed)

        out = out.reshape(3, n_pad)[:, :n_pts].reshape(3, B, HW)
        # TODO(synk): let callers consume the channel-major (3, B, HW) slabs
        # directly and skip this transpose pass (extra ~24 B/pt of HBM).
        return jnp.moveaxis(out, 0, -1)


# ----------------------- pure-JAX reference (for checking) -----------------------
def reference_uv_to_3d(mean_shape, verts, uv):
    face_inds, faces = mean_shape['face_inds'], mean_shape['faces']
    verts_uv, uv_map = mean_shape['uv_verts'], mean_shape['uv_map']
    uv_map_size = jnp.array([uv_map.shape[1] - 1, uv_map.shape[0] - 1], jnp.float32)
    uv_inds = jnp.round(uv * uv_map_size).astype(jnp.int32)
    fidx = face_inds[uv_inds[..., 1], uv_inds[..., 0]]
    tri = faces[fidx]
    face_verts = jax.vmap(lambda vb, tb: vb[tb])(verts, tri)
    face_uv = verts_uv[tri]

    V3 = _sphere_from_uv(face_uv)
    P3 = _sphere_from_uv(uv)
    A, Bv, C = V3[..., 0, :], V3[..., 1, :], V3[..., 2, :]
    AB, AC, AP = Bv - A, C - A, P3 - A
    n = jnp.cross(AB, AC)
    n = n / jnp.maximum(jnp.linalg.norm(n, axis=-1, keepdims=True), _EPS)
    P = AP - n * jnp.sum(n * AP, -1, keepdims=True) + A
    BC = C - Bv
    AP2, BP2 = P - A, P - Bv
    areaBAC = jnp.linalg.norm(jnp.cross(AB, AC), axis=-1)
    w = jnp.linalg.norm(jnp.cross(AB, AP2), axis=-1) / areaBAC
    v = jnp.linalg.norm(jnp.cross(AC, AP2), axis=-1) / areaBAC
    u = jnp.linalg.norm(jnp.cross(BC, BP2), axis=-1) / areaBAC
    bary = jnp.stack([u, v, w], -1)
    bary = bary / jnp.maximum(jnp.sum(jnp.abs(bary), -1, keepdims=True), _EPS)
    return jnp.sum(face_verts * bary[..., None], axis=-2)


if __name__ == "__main__":
    key = jax.random.PRNGKey(0)
    k1, k2, k3 = jax.random.split(key, 3)

    # ---- deterministic synthetic mean_shape ----
    gn = 8                                     # 8x8 uv vertex grid -> V = 64
    V = gn * gn
    lin = jnp.linspace(0.05, 0.95, gn)
    gu, gv = jnp.meshgrid(lin, lin, indexing='xy')
    verts_uv = jnp.stack([gu.reshape(-1), gv.reshape(-1)], -1).astype(jnp.float32)

    face_list = []
    for i in range(gn - 1):
        for j in range(gn - 1):
            a, b, c, d = i * gn + j, i * gn + j + 1, (i + 1) * gn + j, (i + 1) * gn + j + 1
            face_list.append([a, b, c])
            face_list.append([d, c, b])
    faces = jnp.array(face_list, jnp.int32)    # (98, 3), non-degenerate triangles
    F = faces.shape[0]

    Hm = Wm = 17
    uv_map = jnp.zeros((Hm, Wm, 3), jnp.float32)
    face_inds = jax.random.randint(k1, (Hm, Wm), 0, F, dtype=jnp.int32)

    mean_shape = dict(face_inds=face_inds, faces=faces,
                      uv_verts=verts_uv, uv_map=uv_map)

    # ---- example inputs ----
    B, HW = 2, 1024                            # 32x32 uv queries per batch element
    verts = jax.random.normal(k2, (B, V, 3), jnp.float32)
    uv = jax.random.uniform(k3, (B, HW, 2), jnp.float32)

    model = UVTo3D(mean_shape)
    fwd = jax.jit(lambda v, u: model(v, u))
    out = jax.block_until_ready(fwd(verts, uv))
    ref = reference_uv_to_3d(mean_shape, verts, uv)

    assert out.shape == (B, HW, 3)
    assert bool(jnp.all(jnp.isfinite(out)))
    max_err = jnp.max(jnp.abs(out - ref))
    assert bool(jnp.allclose(out, ref, atol=2e-3, rtol=2e-3)), f"max abs err {max_err}"
    print("KERNEL_OK")
</pallas_src>

<mosaic_0001>
module attributes {stable_mosaic.version = 11 : i64} {
  func.func @_uv_to_3d_kernel(%arg0: i32, %arg1: memref<21x8x128xf32, #tpu.memory_space<vmem>>, %arg2: memref<3x8x128xf32, #tpu.memory_space<vmem>>) attributes {dimension_semantics = [#tpu.dimension_semantics<parallel>], iteration_bounds = array<i64: 2>, scalar_prefetch = 0 : i64, scratch_operands = 0 : i64, tpu.core_type = #tpu.core_type<tc>, window_params = [{transform_indices = @transform_0, window_bounds = array<i64: 21, 8, 128>}, {transform_indices = @transform_1, window_bounds = array<i64: 3, 8, 128>}]} {
    %c0 = arith.constant 0 : index
    %c0_0 = arith.constant 0 : index
    %c0_1 = arith.constant 0 : index
    %0 = vector.load %arg1[%c0, %c0_0, %c0_1] : memref<21x8x128xf32, #tpu.memory_space<vmem>>, vector<1x8x128xf32>
    %1 = vector.shape_cast %0 : vector<1x8x128xf32> to vector<8x128xf32>
    %c1 = arith.constant 1 : index
    %c0_2 = arith.constant 0 : index
    %c0_3 = arith.constant 0 : index
    %2 = vector.load %arg1[%c1, %c0_2, %c0_3] : memref<21x8x128xf32, #tpu.memory_space<vmem>>, vector<1x8x128xf32>
    %3 = vector.shape_cast %2 : vector<1x8x128xf32> to vector<8x128xf32>
    %c2 = arith.constant 2 : index
    %c0_4 = arith.constant 0 : index
    %c0_5 = arith.constant 0 : index
    %4 = vector.load %arg1[%c2, %c0_4, %c0_5] : memref<21x8x128xf32, #tpu.memory_space<vmem>>, vector<1x8x128xf32>
    %5 = vector.shape_cast %4 : vector<1x8x128xf32> to vector<8x128xf32>
    %c3 = arith.constant 3 : index
    %c0_6 = arith.constant 0 : index
    %c0_7 = arith.constant 0 : index
    %6 = vector.load %arg1[%c3, %c0_6, %c0_7] : memref<21x8x128xf32, #tpu.memory_space<vmem>>, vector<1x8x128xf32>
    %7 = vector.shape_cast %6 : vector<1x8x128xf32> to vector<8x128xf32>
    %8 = arith.subf %7, %1 : vector<8x128xf32>
    %c4 = arith.constant 4 : index
    %c0_8 = arith.constant 0 : index
    %c0_9 = arith.constant 0 : index
    %9 = vector.load %arg1[%c4, %c0_8, %c0_9] : memref<21x8x128xf32, #tpu.memory_space<vmem>>, vector<1x8x128xf32>
    %10 = vector.shape_cast %9 : vector<1x8x128xf32> to vector<8x128xf32>
    %11 = arith.subf %10, %3 : vector<8x128xf32>
    %c5 = arith.constant 5 : index
    %c0_10 = arith.constant 0 : index
    %c0_11 = arith.constant 0 : index
    %12 = vector.load %arg1[%c5, %c0_10, %c0_11] : memref<21x8x128xf32, #tpu.memory_space<vmem>>, vector<1x8x128xf32>
    %13 = vector.shape_cast %12 : vector<1x8x128xf32> to vector<8x128xf32>
    %14 = arith.subf %13, %5 : vector<8x128xf32>
    %c6 = arith.constant 6 : index
    %c0_12 = arith.constant 0 : index
    %c0_13 = arith.constant 0 : index
    %15 = vector.load %arg1[%c6, %c0_12, %c0_13] : memref<21x8x128xf32, #tpu.memory_space<vmem>>, vector<1x8x128xf32>
    %16 = vector.shape_cast %15 : vector<1x8x128xf32> to vector<8x128xf32>
    %17 = arith.subf %16, %1 : vector<8x128xf32>
    %c7 = arith.constant 7 : index
    %c0_14 = arith.constant 0 : index
    %c0_15 = arith.constant 0 : index
    %18 = vector.load %arg1[%c7, %c0_14, %c0_15] : memref<21x8x128xf32, #tpu.memory_space<vmem>>, vector<1x8x128xf32>
    %19 = vector.shape_cast %18 : vector<1x8x128xf32> to vector<8x128xf32>
    %20 = arith.subf %19, %3 : vector<8x128xf32>
    %c8 = arith.constant 8 : index
    %c0_16 = arith.constant 0 : index
    %c0_17 = arith.constant 0 : index
    %21 = vector.load %arg1[%c8, %c0_16, %c0_17] : memref<21x8x128xf32, #tpu.memory_space<vmem>>, vector<1x8x128xf32>
    %22 = vector.shape_cast %21 : vector<1x8x128xf32> to vector<8x128xf32>
    %23 = arith.subf %22, %5 : vector<8x128xf32>
    %c9 = arith.constant 9 : index
    %c0_18 = arith.constant 0 : index
    %c0_19 = arith.constant 0 : index
    %24 = vector.load %arg1[%c9, %c0_18, %c0_19] : memref<21x8x128xf32, #tpu.memory_space<vmem>>, vector<1x8x128xf32>
    %25 = vector.shape_cast %24 : vector<1x8x128xf32> to vector<8x128xf32>
    %26 = arith.subf %25, %1 : vector<8x128xf32>
    %c10 = arith.constant 10 : index
    %c0_20 = arith.constant 0 : index
    %c0_21 = arith.constant 0 : index
    %27 = vector.load %arg1[%c10, %c0_20, %c0_21] : memref<21x8x128xf32, #tpu.memory_space<vmem>>, vector<1x8x128xf32>
    %28 = vector.shape_cast %27 : vector<1x8x128xf32> to vector<8x128xf32>
    %29 = arith.subf %28, %3 : vector<8x128xf32>
    %c11 = arith.constant 11 : index
    %c0_22 = arith.constant 0 : index
    %c0_23 = arith.constant 0 : index
    %30 = vector.load %arg1[%c11, %c0_22, %c0_23] : memref<21x8x128xf32, #tpu.memory_space<vmem>>, vector<1x8x128xf32>
    %31 = vector.shape_cast %30 : vector<1x8x128xf32> to vector<8x128xf32>
    %32 = arith.subf %31, %5 : vector<8x128xf32>
    %33 = arith.mulf %11, %23 : vector<8x128xf32>
    %34 = arith.mulf %14, %20 : vector<8x128xf32>
    %35 = arith.subf %33, %34 : vector<8x128xf32>
    %36 = arith.mulf %14, %17 : vector<8x128xf32>
    %37 = arith.mulf %8, %23 : vector<8x128xf32>
    %38 = arith.subf %36, %37 : vector<8x128xf32>
    %39 = arith.mulf %8, %20 : vector<8x128xf32>
    %40 = arith.mulf %11, %17 : vector<8x128xf32>
    %41 = arith.subf %39, %40 : vector<8x128xf32>
    %42 = arith.mulf %35, %35 : vector<8x128xf32>
    %43 = arith.mulf %38, %38 : vector<8x128xf32>
    %44 = arith.addf %42, %43 : vector<8x128xf32>
    %45 = arith.mulf %41, %41 : vector<8x128xf32>
    %46 = arith.addf %44, %45 : vector<8x128xf32>
    %47 = arith.mulf %35, %26 : vector<8x128xf32>
    %48 = arith.mulf %38, %29 : vector<8x128xf32>
    %49 = arith.addf %47, %48 : vector<8x128xf32>
    %50 = arith.mulf %41, %32 : vector<8x128xf32>
    %51 = arith.addf %49, %50 : vector<8x128xf32>
    %cst = arith.constant 1.000000e-24 : f32
    %52 = vector.broadcast %cst : f32 to vector<8x128xf32>
    %53 = arith.maximumf %46, %52 : vector<8x128xf32>
    %54 = arith.divf %51, %53 : vector<8x128xf32>
    %55 = arith.mulf %35, %54 : vector<8x128xf32>
    %56 = arith.subf %26, %55 : vector<8x128xf32>
    %57 = arith.mulf %38, %54 : vector<8x128xf32>
    %58 = arith.subf %29, %57 : vector<8x128xf32>
    %59 = arith.mulf %41, %54 : vector<8x128xf32>
    %60 = arith.subf %32, %59 : vector<8x128xf32>
    %61 = arith.subf %56, %8 : vector<8x128xf32>
    %62 = arith.subf %58, %11 : vector<8x128xf32>
    %63 = arith.subf %60, %14 : vector<8x128xf32>
    %64 = arith.subf %17, %8 : vector<8x128xf32>
    %65 = arith.subf %20, %11 : vector<8x128xf32>
    %66 = arith.subf %23, %14 : vector<8x128xf32>
    %67 = arith.mulf %11, %60 : vector<8x128xf32>
    %68 = arith.mulf %14, %58 : vector<8x128xf32>
    %69 = arith.subf %67, %68 : vector<8x128xf32>
    %70 = arith.mulf %14, %56 : vector<8x128xf32>
    %71 = arith.mulf %8, %60 : vector<8x128xf32>
    %72 = arith.subf %70, %71 : vector<8x128xf32>
    %73 = arith.mulf %8, %58 : vector<8x128xf32>
    %74 = arith.mulf %11, %56 : vector<8x128xf32>
    %75 = arith.subf %73, %74 : vector<8x128xf32>
    %76 = arith.mulf %69, %69 : vector<8x128xf32>
    %77 = arith.mulf %72, %72 : vector<8x128xf32>
    %78 = arith.addf %76, %77 : vector<8x128xf32>
    %79 = arith.mulf %75, %75 : vector<8x128xf32>
    %80 = arith.addf %78, %79 : vector<8x128xf32>
    %81 = math.sqrt %80 : vector<8x128xf32>
    %82 = arith.mulf %20, %60 : vector<8x128xf32>
    %83 = arith.mulf %23, %58 : vector<8x128xf32>
    %84 = arith.subf %82, %83 : vector<8x128xf32>
    %85 = arith.mulf %23, %56 : vector<8x128xf32>
    %86 = arith.mulf %17, %60 : vector<8x128xf32>
    %87 = arith.subf %85, %86 : vector<8x128xf32>
    %88 = arith.mulf %17, %58 : vector<8x128xf32>
    %89 = arith.mulf %20, %56 : vector<8x128xf32>
    %90 = arith.subf %88, %89 : vector<8x128xf32>
    %91 = arith.mulf %84, %84 : vector<8x128xf32>
    %92 = arith.mulf %87, %87 : vector<8x128xf32>
    %93 = arith.addf %91, %92 : vector<8x128xf32>
    %94 = arith.mulf %90, %90 : vector<8x128xf32>
    %95 = arith.addf %93, %94 : vector<8x128xf32>
    %96 = math.sqrt %95 : vector<8x128xf32>
    %97 = arith.mulf %65, %63 : vector<8x128xf32>
    %98 = arith.mulf %66, %62 : vector<8x128xf32>
    %99 = arith.subf %97, %98 : vector<8x128xf32>
    %100 = arith.mulf %66, %61 : vector<8x128xf32>
    %101 = arith.mulf %64, %63 : vector<8x128xf32>
    %102 = arith.subf %100, %101 : vector<8x128xf32>
    %103 = arith.mulf %64, %62 : vector<8x128xf32>
    %104 = arith.mulf %65, %61 : vector<8x128xf32>
    %105 = arith.subf %103, %104 : vector<8x128xf32>
    %106 = arith.mulf %99, %99 : vector<8x128xf32>
    %107 = arith.mulf %102, %102 : vector<8x128xf32>
    %108 = arith.addf %106, %107 : vector<8x128xf32>
    %109 = arith.mulf %105, %105 : vector<8x128xf32>
    %110 = arith.addf %108, %109 : vector<8x128xf32>
    %111 = math.sqrt %110 : vector<8x128xf32>
    %112 = arith.addf %81, %96 : vector<8x128xf32>
    %113 = arith.addf %112, %111 : vector<8x128xf32>
    %cst_24 = arith.constant 9.99999996E-13 : f32
    %114 = vector.broadcast %cst_24 : f32 to vector<8x128xf32>
    %115 = arith.maximumf %113, %114 : vector<8x128xf32>
    %cst_25 = arith.constant 1.000000e+00 : f32
    %116 = vector.broadcast %cst_25 : f32 to vector<8x128xf32>
    %117 = arith.divf %116, %115 : vector<8x128xf32>
    %118 = arith.mulf %81, %117 : vector<8x128xf32>
    %119 = arith.mulf %96, %117 : vector<8x128xf32>
    %120 = arith.mulf %111, %117 : vector<8x128xf32>
    %c12 = arith.constant 12 : index
    %c0_26 = arith.constant 0 : index
    %c0_27 = arith.constant 0 : index
    %121 = vector.load %arg1[%c12, %c0_26, %c0_27] : memref<21x8x128xf32, #tpu.memory_space<vmem>>, vector<1x8x128xf32>
    %122 = vector.shape_cast %121 : vector<1x8x128xf32> to vector<8x128xf32>
    %123 = arith.mulf %120, %122 : vector<8x128xf32>
    %c15 = arith.constant 15 : index
    %c0_28 = arith.constant 0 : index
    %c0_29 = arith.constant 0 : index
    %124 = vector.load %arg1[%c15, %c0_28, %c0_29] : memref<21x8x128xf32, #tpu.memory_space<vmem>>, vector<1x8x128xf32>
    %125 = vector.shape_cast %124 : vector<1x8x128xf32> to vector<8x128xf32>
    %126 = arith.mulf %119, %125 : vector<8x128xf32>
    %127 = arith.addf %123, %126 : vector<8x128xf32>
    %c18 = arith.constant 18 : index
    %c0_30 = arith.constant 0 : index
    %c0_31 = arith.constant 0 : index
    %128 = vector.load %arg1[%c18, %c0_30, %c0_31] : memref<21x8x128xf32, #tpu.memory_space<vmem>>, vector<1x8x128xf32>
    %129 = vector.shape_cast %128 : vector<1x8x128xf32> to vector<8x128xf32>
    %130 = arith.mulf %118, %129 : vector<8x128xf32>
    %131 = arith.addf %127, %130 : vector<8x128xf32>
    %c0_32 = arith.constant 0 : index
    %c0_33 = arith.constant 0 : index
    %c0_34 = arith.constant 0 : index
    %132 = vector.load %arg2[%c0_32, %c0_33, %c0_34] : memref<3x8x128xf32, #tpu.memory_space<vmem>>, vector<1x8x128xf32>
    %133 = vector.shape_cast %132 : vector<1x8x128xf32> to vector<8x128xf32>
    %134 = vector.shape_cast %131 : vector<8x128xf32> to vector<1x8x128xf32>
    tpu.vector_store %arg2[%c0_32, %c0_33, %c0_34], %134 {strides = array<i32>} : memref<3x8x128xf32, #tpu.memory_space<vmem>>, vector<1x8x128xf32>,
    %c13 = arith.constant 13 : index
    %c0_35 = arith.constant 0 : index
    %c0_36 = arith.constant 0 : index
    %135 = vector.load %arg1[%c13, %c0_35, %c0_36] : memref<21x8x128xf32, #tpu.memory_space<vmem>>, vector<1x8x128xf32>
    %136 = vector.shape_cast %135 : vector<1x8x128xf32> to vector<8x128xf32>
    %137 = arith.mulf %120, %136 : vector<8x128xf32>
    %c16 = arith.constant 16 : index
    %c0_37 = arith.constant 0 : index
    %c0_38 = arith.constant 0 : index
    %138 = vector.load %arg1[%c16, %c0_37, %c0_38] : memref<21x8x128xf32, #tpu.memory_space<vmem>>, vector<1x8x128xf32>
    %139 = vector.shape_cast %138 : vector<1x8x128xf32> to vector<8x128xf32>
    %140 = arith.mulf %119, %139 : vector<8x128xf32>
    %141 = arith.addf %137, %140 : vector<8x128xf32>
    %c19 = arith.constant 19 : index
    %c0_39 = arith.constant 0 : index
    %c0_40 = arith.constant 0 : index
    %142 = vector.load %arg1[%c19, %c0_39, %c0_40] : memref<21x8x128xf32, #tpu.memory_space<vmem>>, vector<1x8x128xf32>
    %143 = vector.shape_cast %142 : vector<1x8x128xf32> to vector<8x128xf32>
    %144 = arith.mulf %118, %143 : vector<8x128xf32>
    %145 = arith.addf %141, %144 : vector<8x128xf32>
    %c1_41 = arith.constant 1 : index
    %c0_42 = arith.constant 0 : index
    %c0_43 = arith.constant 0 : index
    %146 = vector.load %arg2[%c1_41, %c0_42, %c0_43] : memref<3x8x128xf32, #tpu.memory_space<vmem>>, vector<1x8x128xf32>
    %147 = vector.shape_cast %146 : vector<1x8x128xf32> to vector<8x128xf32>
    %148 = vector.shape_cast %145 : vector<8x128xf32> to vector<1x8x128xf32>
    tpu.vector_store %arg2[%c1_41, %c0_42, %c0_43], %148 {strides = array<i32>} : memref<3x8x128xf32, #tpu.memory_space<vmem>>, vector<1x8x128xf32>,
    %c14 = arith.constant 14 : index
    %c0_44 = arith.constant 0 : index
    %c0_45 = arith.constant 0 : index
    %149 = vector.load %arg1[%c14, %c0_44, %c0_45] : memref<21x8x128xf32, #tpu.memory_space<vmem>>, vector<1x8x128xf32>
    %150 = vector.shape_cast %149 : vector<1x8x128xf32> to vector<8x128xf32>
    %151 = arith.mulf %120, %150 : vector<8x128xf32>
    %c17 = arith.constant 17 : index
    %c0_46 = arith.constant 0 : index
    %c0_47 = arith.constant 0 : index
    %152 = vector.load %arg1[%c17, %c0_46, %c0_47] : memref<21x8x128xf32, #tpu.memory_space<vmem>>, vector<1x8x128xf32>
    %153 = vector.shape_cast %152 : vector<1x8x128xf32> to vector<8x128xf32>
    %154 = arith.mulf %119, %153 : vector<8x128xf32>
    %155 = arith.addf %151, %154 : vector<8x128xf32>
    %c20 = arith.constant 20 : index
    %c0_48 = arith.constant 0 : index
    %c0_49 = arith.constant 0 : index
    %156 = vector.load %arg1[%c20, %c0_48, %c0_49] : memref<21x8x128xf32, #tpu.memory_space<vmem>>, vector<1x8x128xf32>
    %157 = vector.shape_cast %156 : vector<1x8x128xf32> to vector<8x128xf32>
    %158 = arith.mulf %118, %157 : vector<8x128xf32>
    %159 = arith.addf %155, %158 : vector<8x128xf32>
    %c2_50 = arith.constant 2 : index
    %c0_51 = arith.constant 0 : index
    %c0_52 = arith.constant 0 : index
    %160 = vector.load %arg2[%c2_50, %c0_51, %c0_52] : memref<3x8x128xf32, #tpu.memory_space<vmem>>, vector<1x8x128xf32>
    %161 = vector.shape_cast %160 : vector<1x8x128xf32> to vector<8x128xf32>
    %162 = vector.shape_cast %159 : vector<8x128xf32> to vector<1x8x128xf32>
    tpu.vector_store %arg2[%c2_50, %c0_51, %c0_52], %162 {strides = array<i32>} : memref<3x8x128xf32, #tpu.memory_space<vmem>>, vector<1x8x128xf32>,
    return
  }
  func.func @transform_0(%arg0: i32) -> (i32, i32, i32) {
    %c0_i32 = arith.constant 0 : i32
    %c0_i32_0 = arith.constant 0 : i32
    %c0_i32_1 = arith.constant 0 : i32
    return %c0_i32, %arg0, %c0_i32_0 : i32, i32, i32
  }
  func.func @transform_1(%arg0: i32) -> (i32, i32, i32) {
    %c0_i32 = arith.constant 0 : i32
    %c0_i32_0 = arith.constant 0 : i32
    %c0_i32_1 = arith.constant 0 : i32
    return %c0_i32, %arg0, %c0_i32_0 : i32, i32, i32
  }
}

</mosaic_0001>

<bundles_post_ra>
// kernel: _lambda_.1
= control target key start
LH: loop header
LB: loop body
LE: loop exit
PB: predicated region body
PF: predicated region fallthrough
CT: control target
= control target key end

     0   :  { %s609_s6 = smov 0   ;;  %s611_s7 = smov 0   ;;  %s742_s0 = inlined_call_operand.vmem [shape: f32[21,16,128], index: 0, kind: input, shape index: {}]   ;;  %s743_s1 = inlined_call_operand.vmem [shape: f32[3,16,128], index: 1, kind: output, shape index: {}]  }
   0x1   :  { %s613_s8 = smov 0  }
   0x2 LB: > { %s507_s9 = sadd.s32 4294967295, %s597_s8   ;;  %s626_s10 = sadd.s32 1, %s597_s8   ;;  %s597_s8 = sphi %s613_s8, %s747_s8   ;;  %s593_s7 = sphi %s611_s7, %s746_s7   ;;  %s589_s6 = sphi %s609_s6, %s745_s6  }
   0x3   : > { %s15_s11 = ssub.s32 %s597_s8, %s626_s10  ;;  %s18_s12 = sadd.s32 1, %s593_s7 }
   0x4   : > { %p16_p0 = scmp.eq.s32.totalorder %s15_s11, 0  ;;  %p25_p1 = scmp.ne.s32.totalorder %s593_s7, %s589_s6 }
   0x5   : > { %p26_p2 = scmp.eq.s32.totalorder %s597_s8, 0  ;;  %p55_p3 = scmp.eq.s32.totalorder %s507_s9, 1 }
   0x6   : > { %s637_s13 = scalar_select %p16_p0, %s593_s7, %s18_s12  }
   0x7   : > { %p27_p4 = por %p26_p2, %p25_p1  ;;  %p639_p5 = por %p55_p3, %p25_p1 }
   0x8   : > { %p510_p6 = scmp.ge.s32.totalorder %s597_s8, 2 }
   0xa   : > { %77 = sbr.rel (%p510_p6) target bundleno = 30 (0x1e), region = 16 }
   0xf   : > { %80 = sbr.rel (!%p27_p4) target bundleno = 30 (0x1e), region = 20  ;;  %s82_s15 = sand.u32 (%p27_p4), 1, %s593_s7  }
  0x10   : > { %s511_s16 = sshll.u32 (%p27_p4), %s597_s8, 3  ;;  %s538_s17 = smul.u32 (%p27_p4), 168, %s82_s15 }
  0x11   : > { %s649_s20 = scalar_lea.vmem (%p27_p4), %s742_s0, %s511_s16 }
  0x12   : > { %v155_v0 = vld [vmem:[%s649_s20] sm:$0xff] (%p27_p4)  ;;  %v157_v1 = vld [vmem:[%s649_s20 + $0x10] sm:$0xff] (%p27_p4)  ;;  %s657_s21 = scalar_lea.vmem (%p27_p4), [#allocation2], %s538_s17 }
  0x13   : > { %v159_v2 = vld [vmem:[%s649_s20 + $0x20] sm:$0xff] (%p27_p4)  ;;  %v161_v3 = vld [vmem:[%s649_s20 + $0x30] sm:$0xff] (%p27_p4)  ;;  %156 = vst [vmem:[%s657_s21] sm:$0xff] (%p27_p4), %v155_v0  ;;  %158 = vst [vmem:[%s657_s21 + $0x8] sm:$0xff] (%p27_p4), %v157_v1 }
  0x14   : > { %v163_v4 = vld [vmem:[%s649_s20 + $0x40] sm:$0xff]  ;;  %v165_v5 = vld [vmem:[%s649_s20 + $0x50] sm:$0xff]  ;;  %160 = vst [vmem:[%s657_s21 + $0x10] sm:$0xff] %v159_v2  ;;  %162 = vst [vmem:[%s657_s21 + $0x18] sm:$0xff] %v161_v3 }
  0x15   : > { %164 = vst [vmem:[%s657_s21 + $0x20] sm:$0xff] %v163_v4  ;;  %166 = vst [vmem:[%s657_s21 + $0x28] sm:$0xff] %v165_v5  ;;  %v167_v6 = vld [vmem:[%s649_s20 + $0x60] sm:$0xff]  ;;  %v169_v7 = vld [vmem:[%s649_s20 + $0x70] sm:$0xff] }
  0x16   : > { %v171_v8 = vld [vmem:[%s649_s20 + $0x80] sm:$0xff]  ;;  %168 = vst [vmem:[%s657_s21 + $0x30] sm:$0xff] %v167_v6  ;;  %170 = vst [vmem:[%s657_s21 + $0x38] sm:$0xff] %v169_v7  ;;  %v173_v9 = vld [vmem:[%s649_s20 + $0x90] sm:$0xff] }
  0x17   : > { %172 = vst [vmem:[%s657_s21 + $0x40] sm:$0xff] %v171_v8  ;;  %v175_v10 = vld [vmem:[%s649_s20 + $0xa0] sm:$0xff]  ;;  %v177_v11 = vld [vmem:[%s649_s20 + $0xb0] sm:$0xff]  ;;  %174 = vst [vmem:[%s657_s21 + $0x48] sm:$0xff] %v173_v9 }
  0x18   : > { %176 = vst [vmem:[%s657_s21 + $0x50] sm:$0xff] %v175_v10  ;;  %178 = vst [vmem:[%s657_s21 + $0x58] sm:$0xff] %v177_v11  ;;  %v179_v12 = vld [vmem:[%s649_s20 + $0xc0] sm:$0xff]  ;;  %v181_v13 = vld [vmem:[%s649_s20 + $0xd0] sm:$0xff] }
  0x19   : > { %v183_v14 = vld [vmem:[%s649_s20 + $0xe0] sm:$0xff]  ;;  %180 = vst [vmem:[%s657_s21 + $0x60] sm:$0xff] %v179_v12  ;;  %182 = vst [vmem:[%s657_s21 + $0x68] sm:$0xff] %v181_v13  ;;  %v185_v15 = vld [vmem:[%s649_s20 + $0xf0] sm:$0xff] }
  0x1a   : > { %184 = vst [vmem:[%s657_s21 + $0x70] sm:$0xff] %v183_v14  ;;  %v187_v16 = vld [vmem:[%s649_s20 + $0x100] sm:$0xff]  ;;  %v189_v17 = vld [vmem:[%s649_s20 + $0x110] sm:$0xff]  ;;  %186 = vst [vmem:[%s657_s21 + $0x78] sm:$0xff] %v185_v15 }
  0x1b   : > { %188 = vst [vmem:[%s657_s21 + $0x80] sm:$0xff] %v187_v16  ;;  %190 = vst [vmem:[%s657_s21 + $0x88] sm:$0xff] %v189_v17  ;;  %v191_v18 = vld [vmem:[%s649_s20 + $0x120] sm:$0xff]  ;;  %v193_v19 = vld [vmem:[%s649_s20 + $0x130] sm:$0xff] }
  0x1c   : > { %v195_v20 = vld [vmem:[%s649_s20 + $0x140] sm:$0xff]  ;;  %192 = vst [vmem:[%s657_s21 + $0x90] sm:$0xff] %v191_v18  ;;  %194 = vst [vmem:[%s657_s21 + $0x98] sm:$0xff] %v193_v19 }
  0x1d   : > { %196 = vst [vmem:[%s657_s21 + $0xa0] sm:$0xff] %v195_v20 }
  0x1e PF: > { %p512_p7 = scmp.ge.s32.totalorder %s597_s8, 1  ;;  %p201_p8 = scmp.lt.s32.totalorder %s597_s8, 3 }
  0x20   : > { %p202_p9 = pnand %p512_p7, %p201_p8 }
  0x21   : > { %s208_s22 = sand.u32 (!%p202_p9), 1, %s589_s6  }
  0x22   : > { %205 = sbr.rel (%p202_p9) target bundleno = 147 (0x93), region = 58 }
  0x23   : > { %s539_s23 = smul.u32 (!%p202_p9), 168, %s208_s22 }
  0x24   : > { %s540_s25 = smul.u32 (!%p202_p9), 24, %s208_s22 }
  0x25   : > { %s700_s24 = scalar_lea.vmem (!%p202_p9), [#allocation2], %s539_s23 }
  0x26   : > { %s225_s26 = scalar_lea.vmem (!%p202_p9), [#allocation3], %s540_s25 }
  0x27   : > { %v226_v21 = vld [vmem:[%s700_s24] sm:$0xff]  ;;  %v513_v22 = vld [vmem:[%s700_s24 + $0x8] sm:$0xff]  ;;  %v514_v23 = vld [vmem:[%s700_s24 + $0x10] sm:$0xff]  ;;  %s535_s27 = sshll.u32 (%p639_p5), %s507_s9, 3 }
  0x28   : > { %v515_v24 = vld [vmem:[%s700_s24 + $0x18] sm:$0xff]  ;;  %v516_v25 = vld [vmem:[%s700_s24 + $0x20] sm:$0xff]  ;;  %v517_v26 = vld [vmem:[%s700_s24 + $0x28] sm:$0xff]  ;;  %s409_s30 = scalar_lea.vmem (%p639_p5), %s743_s1, %s535_s27 }
  0x29   : > { %v233_v27 = vsub.f32 %v515_v24, %v226_v21  ;;  %v236_v28 = vsub.f32 %v516_v25, %v513_v22  ;;  %v239_v29 = vsub.f32 %v517_v26, %v514_v23  ;;  %v518_v30 = vld [vmem:[%s700_s24 + $0x30] sm:$0xff]  ;;  %v519_v31 = vld [vmem:[%s700_s24 + $0x38] sm:$0xff]  ;;  %v520_v32 = vld [vmem:[%s700_s24 + $0x40] sm:$0xff] }
  0x2a   : > { %v242_v33 = vsub.f32 %v518_v30, %v226_v21  ;;  %v245_v34 = vsub.f32 %v519_v31, %v513_v22  ;;  %v248_v35 = vsub.f32 %v520_v32, %v514_v23  ;;  %v521_v49 = vld [vmem:[%s700_s24 + $0x48] sm:$0xff]  ;;  %v522_v50 = vld [vmem:[%s700_s24 + $0x50] sm:$0xff]  ;;  %v523_v55 = vld [vmem:[%s700_s24 + $0x58] sm:$0xff] }
  0x2b   : > { %v251_v52 = vsub.f32 %v521_v49, %v226_v21  ;;  %v254_v53 = vsub.f32 %v522_v50, %v513_v22  ;;  %v257_v56 = vsub.f32 %v523_v55, %v514_v23 }
  0x2c   : > { %v258_v36 = vmul.f32 %v248_v35, %v236_v28  ;;  %v259_v37 = vmul.f32 %v245_v34, %v239_v29  ;;  %v261_v38 = vmul.f32 %v242_v33, %v239_v29  ;;  %v262_v39 = vmul.f32 %v248_v35, %v233_v27 }
  0x2d   : > { %v264_v40 = vmul.f32 %v245_v34, %v233_v27  ;;  %v265_v41 = vmul.f32 %v242_v33, %v236_v28  ;;  %v289_v6 = vsub.f32 %v242_v33, %v233_v27  ;;  %v290_v7 = vsub.f32 %v245_v34, %v236_v28 }
  0x2e   : > { %v260_v42 = vsub.f32 %v258_v36, %v259_v37  ;;  %v263_v43 = vsub.f32 %v261_v38, %v262_v39  ;;  %v291_v8 = vsub.f32 %v248_v35, %v239_v29 }
  0x2f   : > { %v266_v44 = vsub.f32 %v264_v40, %v265_v41 }
  0x30   : > { %v267_v45 = vmul.f32 %v260_v42, %v260_v42  ;;  %v268_v46 = vmul.f32 %v263_v43, %v263_v43  ;;  %v272_v57 = vmul.f32 %v260_v42, %v251_v52  ;;  %v273_v58 = vmul.f32 %v263_v43, %v254_v53 }
  0x31   : > { %v270_v47 = vmul.f32 %v266_v44, %v266_v44  ;;  %v275_v60 = vmul.f32 %v266_v44, %v257_v56 }
  0x32   : > { %v269_v48 = vadd.f32 %v268_v46, %v267_v45  ;;  %v274_v59 = vadd.f32 %v273_v58, %v272_v57 }
  0x34   : > { %v271_v51 = vadd.f32 %v270_v47, %v269_v48  ;;  %v276_v61 = vadd.f32 %v275_v60, %v274_v59 }
  0x36   : > { %v277_v54 = vmax.f32 %v271_v51, 1e-24 }
  0x38   : > { %565 = vrcp.f32 %v277_v54 }
  0x45   : > { %v566_v62 = vpop.eup %565 }
  0x46   : > { %v279_v63 = vmul.f32 %v566_v62, %v276_v61 }
  0x48   : > { %v280_v0 = vmul.f32 %v279_v63, %v260_v42  ;;  %v282_v1 = vmul.f32 %v279_v63, %v263_v43  ;;  %v284_v2 = vmul.f32 %v279_v63, %v266_v44 }
  0x4a   : > { %v281_v3 = vsub.f32 %v251_v52, %v280_v0  ;;  %v283_v4 = vsub.f32 %v254_v53, %v282_v1  ;;  %v285_v5 = vsub.f32 %v257_v56, %v284_v2 }
  0x4c   : > { %v286_v9 = vsub.f32 %v281_v3, %v233_v27  ;;  %v287_v10 = vsub.f32 %v283_v4, %v236_v28  ;;  %v288_v11 = vsub.f32 %v285_v5, %v239_v29  ;;  %v292_v12 = vmul.f32 %v285_v5, %v236_v28 }
  0x4d   : > { %v293_v13 = vmul.f32 %v283_v4, %v239_v29  ;;  %v295_v14 = vmul.f32 %v281_v3, %v239_v29  ;;  %v296_v15 = vmul.f32 %v285_v5, %v233_v27  ;;  %v298_v16 = vmul.f32 %v283_v4, %v233_v27 }
  0x4e   : > { %v299_v17 = vmul.f32 %v281_v3, %v236_v28  ;;  %v313_v18 = vmul.f32 %v285_v5, %v245_v34  ;;  %v314_v19 = vmul.f32 %v283_v4, %v248_v35  ;;  %v316_v20 = vmul.f32 %v281_v3, %v248_v35 }
  0x4f   : > { %v294_v21 = vsub.f32 %v292_v12, %v293_v13  ;;  %v297_v22 = vsub.f32 %v295_v14, %v296_v15  ;;  %v317_v23 = vmul.f32 %v285_v5, %v242_v33  ;;  %v319_v24 = vmul.f32 %v283_v4, %v242_v33  ;;  %v527_v12 = vld [vmem:[%s700_s24 + $0x68] sm:$0xff]  ;;  %v528_v13 = vld [vmem:[%s700_s24 + $0x80] sm:$0xff] }
  0x50   : > { %v300_v25 = vsub.f32 %v298_v16, %v299_v17  ;;  %v315_v26 = vsub.f32 %v313_v18, %v314_v19  ;;  %v320_v30 = vmul.f32 %v281_v3, %v245_v34  ;;  %v334_v31 = vmul.f32 %v290_v7, %v288_v11  ;;  %v529_v17 = vld [vmem:[%s700_s24 + $0x98] sm:$0xff]  ;;  %v531_v18 = vld [vmem:[%s700_s24 + $0x70] sm:$0xff]  ;;  %v532_v19 = vld [vmem:[%s700_s24 + $0x88] sm:$0xff] }
  0x51   : > { %v301_v32 = vmul.f32 %v294_v21, %v294_v21  ;;  %v302_v36 = vmul.f32 %v297_v22, %v297_v22  ;;  %v318_v37 = vsub.f32 %v316_v20, %v317_v23  ;;  %v335_v38 = vmul.f32 %v291_v8, %v287_v10  ;;  %v533_v20 = vld [vmem:[%s700_s24 + $0xa0] sm:$0xff] }
  0x52   : > { %v304_v39 = vmul.f32 %v300_v25, %v300_v25  ;;  %v321_v29 = vsub.f32 %v319_v24, %v320_v30  ;;  %v322_v40 = vmul.f32 %v315_v26, %v315_v26  ;;  %v337_v27 = vmul.f32 %v291_v8, %v286_v9  ;;  %v524_v8 = vld [vmem:[%s700_s24 + $0x60] sm:$0xff] }
  0x53   : > { %v303_v28 = vadd.f32 %v302_v36, %v301_v32  ;;  %v323_v41 = vmul.f32 %v318_v37, %v318_v37  ;;  %v336_v42 = vsub.f32 %v334_v31, %v335_v38  ;;  %v338_v35 = vmul.f32 %v289_v6, %v288_v11  ;;  %v526_v11 = vld [vmem:[%s700_s24 + $0x90] sm:$0xff] }
  0x54   : > { %v325_v43 = vmul.f32 %v321_v29, %v321_v29  ;;  %v340_v44 = vmul.f32 %v289_v6, %v287_v10  ;;  %v341_v45 = vmul.f32 %v290_v7, %v286_v9  ;;  %v525_v9 = vld [vmem:[%s700_s24 + $0x78] sm:$0xff] }
  0x55   : > { %v305_v33 = vadd.f32 %v304_v39, %v303_v28  ;;  %v324_v46 = vadd.f32 %v323_v41, %v322_v40  ;;  %v339_v47 = vsub.f32 %v337_v27, %v338_v35  ;;  %v343_v48 = vmul.f32 %v336_v42, %v336_v42 }
  0x56   : > { %v342_v34 = vsub.f32 %v340_v44, %v341_v45 }
  0x57   : > { %567 = vrsqrt.f32 %v305_v33  ;;  %v326_v49 = vadd.f32 %v325_v43, %v324_v46  ;;  %v344_v50 = vmul.f32 %v339_v47, %v339_v47  ;;  %vm308_vm0 = vcmp.eq.f32.partialorder %v305_v33, inf }
  0x58   : > { %v346_v51 = vmul.f32 %v342_v34, %v342_v34  ;;  %v311_v56 = vand.u32 2147483648, %v305_v33  ;;  %vm310_vm1 = vcmp.eq.f32.partialorder %v305_v33, 0.0 }
  0x59   : > { %569 = vrsqrt.f32 %v326_v49  ;;  %v345_v52 = vadd.f32 %v344_v50, %v343_v48  ;;  %vm329_vm2 = vcmp.eq.f32.partialorder %v326_v49, inf  ;;  %v332_v59 = vand.u32 2147483648, %v326_v49 }
  0x5a   : > { %vm331_vm3 = vcmp.eq.f32.partialorder %v326_v49, 0.0 }
  0x5b   : > { %v347_v53 = vadd.f32 %v346_v51, %v345_v52 }
  0x5d   : > { %571 = vrsqrt.f32 %v347_v53  ;;  %vm350_vm4 = vcmp.eq.f32.partialorder %v347_v53, inf  ;;  %v353_v1 = vand.u32 2147483648, %v347_v53  ;;  %vm352_vm5 = vcmp.eq.f32.partialorder %v347_v53, 0.0 }
  0x64   : > { %v568_v54 = vpop.eup %567 }
  0x65   : > { %v307_v55 = vmul.f32 %v568_v54, %v305_v33 }
  0x66   : > { %v570_v57 = vpop.eup %569 }
  0x67   : > { %v309_v58 = vsel %vm308_vm0, %v305_v33, %v307_v55  ;;  %v328_v60 = vmul.f32 %v570_v57, %v326_v49 }
  0x68   : > { %v312_v61 = vsel %vm310_vm1, %v311_v56, %v309_v58 }
  0x69   : > { %v330_v62 = vsel %vm329_vm2, %v326_v49, %v328_v60 }
  0x6a   : > { %v333_v63 = vsel %vm331_vm3, %v332_v59, %v330_v62  ;;  %v572_v0 = vpop.eup %571 }
  0x6b   : > { %v349_v2 = vmul.f32 %v572_v0, %v347_v53  ;;  %v355_v3 = vadd.f32 %v333_v63, %v312_v61 }
  0x6d   : > { %v351_v4 = vsel %vm350_vm4, %v347_v53, %v349_v2 }
  0x6e   : > { %v354_v5 = vsel %vm352_vm5, %v353_v1, %v351_v4 }
  0x6f   : > { %v356_v6 = vadd.f32 %v355_v3, %v354_v5 }
  0x71   : > { %v357_v7 = vmax.f32 %v356_v6, 1e-12 }
  0x73   : > { %573 = vrcp.f32 %v357_v7 }
  0x80   : > { %v574_v10 = vpop.eup %573 }
  0x81   : > { %v360_v14 = vmul.f32 %v574_v10, %v312_v61  ;;  %v361_v15 = vmul.f32 %v574_v10, %v333_v63  ;;  %v362_v16 = vmul.f32 %v574_v10, %v354_v5 }
  0x83   : > { %v365_v21 = vmul.f32 %v524_v8, %v362_v16  ;;  %v368_v22 = vmul.f32 %v525_v9, %v361_v15  ;;  %v372_v23 = vmul.f32 %v526_v11, %v360_v14  ;;  %v377_v24 = vmul.f32 %v527_v12, %v362_v16 }
  0x84   : > { %v380_v25 = vmul.f32 %v528_v13, %v361_v15  ;;  %v384_v26 = vmul.f32 %v529_v17, %v360_v14  ;;  %v390_v30 = vmul.f32 %v531_v18, %v362_v16  ;;  %v393_v31 = vmul.f32 %v532_v19, %v361_v15 }
  0x85   : > { %v369_v32 = vadd.f32 %v368_v22, %v365_v21  ;;  %v397_v36 = vmul.f32 %v533_v20, %v360_v14 }
  0x86   : > { %v381_v37 = vadd.f32 %v380_v25, %v377_v24  ;;  %v394_v38 = vadd.f32 %v393_v31, %v390_v30  ;;  %407 = sbr.rel (!%p639_p5) target bundleno = 147 (0x93), region = 66 }
  0x87   : > { %v373_v39 = vadd.f32 %v372_v23, %v369_v32 }
  0x88   : > { %v385_v29 = vadd.f32 %v384_v26, %v381_v37  ;;  %v398_v40 = vadd.f32 %v397_v36, %v394_v38 }
  0x89   : > { %374 = vst [vmem:[%s225_s26] sm:$0xff] %v373_v39 }
  0x8a   : > { %530 = vst [vmem:[%s225_s26 + $0x8] sm:$0xff] %v385_v29  ;;  %534 = vst [vmem:[%s225_s26 + $0x10] sm:$0xff] %v398_v40 }
  0x90   : > { %v442_v27 = vld [vmem:[%s225_s26] sm:$0xff] }
  0x91   : > { %v444_v28 = vld [vmem:[%s225_s26 + $0x8] sm:$0xff]  ;;  %v446_v41 = vld [vmem:[%s225_s26 + $0x10] sm:$0xff]  ;;  %443 = vst [vmem:[%s409_s30] sm:$0xff] %v442_v27 }
  0x92   : > { %445 = vst [vmem:[%s409_s30 + $0x10] sm:$0xff] %v444_v28  ;;  %447 = vst [vmem:[%s409_s30 + $0x20] sm:$0xff] %v446_v41 }
  0x93 PF: > { %p8_p10 = scmp.ge.s32.totalorder %s626_s10, 4   ;;  %s745_s6 = smov %s593_s7 }
  0x94   : > { %s746_s7 = smov %s637_s13  ;;  %s747_s8 = smov %s626_s10 }
  0x95   :  { %10 = sbr.rel (!%p8_p10) target bundleno = 2 (0x2), region = 157 }

</bundles_post_ra>
